<compile_context>
chip_gen: v7x
topology: tpu7x:2x2x1
jax: 0.10.0
libtpu: 0.0.40
codegen_flags: <defaults>
</compile_context>

<pallas_src>
import functools

import jax
import jax.numpy as jnp
from jax import lax
from jax.experimental import pallas as pl
from jax.experimental.pallas import tpu as pltpu

EPS = 1e-5   # PyTorch BatchNorm1d default
C = 14       # feature width of every layer in FcNet


def _layer_kernel(nreal_ref, zin_ref, scale_ref, shift_ref, w_ref,
                  zout_ref, sum_ref, sumsq_ref, *, first):
    """One hidden layer: (previous BN + ReLU) -> Linear(14->14) -> per-channel sum/sumsq."""
    i = pl.program_id(0)

    @pl.when(i == 0)
    def _():
        sum_ref[...] = jnp.zeros_like(sum_ref)
        sumsq_ref[...] = jnp.zeros_like(sumsq_ref)

    zin = zin_ref[...]                                   # (C, tile_n)
    if first:
        a = zin                                          # raw input: no preceding BN/ReLU
    else:
        # Previous layer's BatchNorm folded into a single per-channel scale/shift, then ReLU.
        a = jnp.maximum(zin * scale_ref[...] + shift_ref[...], 0.0)

    # Zero the padded batch columns so this layer's output keeps exact batch statistics.
    tile_n = zin.shape[1]
    col = lax.broadcasted_iota(jnp.int32, (1, tile_n), 1) + i * tile_n
    a = jnp.where(col < nreal_ref[0], a, 0.0)

    # Linear(14->14, no bias) in (C, N) layout: one lane-dense MXU matmul.
    z = jnp.dot(w_ref[...], a, preferred_element_type=jnp.float32)   # (C, tile_n)
    zout_ref[...] = z

    # Accumulate whole-batch per-channel statistics across grid steps (resident outputs).
    sum_ref[...] += jnp.sum(z, axis=1, keepdims=True)
    sumsq_ref[...] += jnp.sum(z * z, axis=1, keepdims=True)


def _final_kernel(zin_ref, scale_ref, shift_ref, w_ref, b_ref, out_ref):
    """Last BN + ReLU + Linear(14->14, bias=True)."""
    a = jnp.maximum(zin_ref[...] * scale_ref[...] + shift_ref[...], 0.0)
    out_ref[...] = (jnp.dot(w_ref[...], a, preferred_element_type=jnp.float32)
                    + b_ref[...])


def _build_layer_call(n_pad, tile_n, first):
    grid = (n_pad // tile_n,)
    flops = (2 * C * C + 6 * C) * n_pad
    bytes_accessed = (2 * C * n_pad + 4 * C + C * C) * 4
    return pl.pallas_call(
        functools.partial(_layer_kernel, first=first),
        grid_spec=pltpu.PrefetchScalarGridSpec(
            num_scalar_prefetch=1,                               # nreal (1,) int32 -> SMEM
            grid=grid,
            in_specs=[
                pl.BlockSpec((C, tile_n), lambda i, nreal: (0, i)),   # z_in / x tile
                pl.BlockSpec((C, 1), lambda i, nreal: (0, 0)),        # folded BN scale (resident)
                pl.BlockSpec((C, 1), lambda i, nreal: (0, 0)),        # folded BN shift (resident)
                pl.BlockSpec((C, C), lambda i, nreal: (0, 0)),        # Linear weight   (resident)
            ],
            out_specs=[
                pl.BlockSpec((C, tile_n), lambda i, nreal: (0, i)),   # z_out tile
                pl.BlockSpec((C, 1), lambda i, nreal: (0, 0)),        # per-channel sum
                pl.BlockSpec((C, 1), lambda i, nreal: (0, 0)),        # per-channel sum of squares
            ],
        ),
        out_shape=[
            jax.ShapeDtypeStruct((C, n_pad), jnp.float32),
            jax.ShapeDtypeStruct((C, 1), jnp.float32),
            jax.ShapeDtypeStruct((C, 1), jnp.float32),
        ],
        compiler_params=pltpu.CompilerParams(
            dimension_semantics=("arbitrary",),        # resident stats accumulator across N
            vmem_limit_bytes=32 * 1024 * 1024),
        cost_estimate=pl.CostEstimate(flops=flops, transcendentals=0,
                                      bytes_accessed=bytes_accessed),
    )


def _build_final_call(n_pad, tile_n):
    grid = (n_pad // tile_n,)
    flops = (2 * C * C + 4 * C) * n_pad
    bytes_accessed = (2 * C * n_pad + 3 * C + C * C) * 4
    return pl.pallas_call(
        _final_kernel,
        grid_spec=pltpu.PrefetchScalarGridSpec(
            num_scalar_prefetch=0,
            grid=grid,
            in_specs=[
                pl.BlockSpec((C, tile_n), lambda i: (0, i)),          # z_5 tile
                pl.BlockSpec((C, 1), lambda i: (0, 0)),               # folded BN scale
                pl.BlockSpec((C, 1), lambda i: (0, 0)),               # folded BN shift
                pl.BlockSpec((C, C), lambda i: (0, 0)),               # fc_out weight
                pl.BlockSpec((C, 1), lambda i: (0, 0)),               # fc_out bias
            ],
            out_specs=pl.BlockSpec((C, tile_n), lambda i: (0, i)),
        ),
        out_shape=jax.ShapeDtypeStruct((C, n_pad), jnp.float32),
        compiler_params=pltpu.CompilerParams(
            dimension_semantics=("parallel",),         # no cross-step state -> megacore on v7x
            vmem_limit_bytes=32 * 1024 * 1024),
        cost_estimate=pl.CostEstimate(flops=flops, transcendentals=0,
                                      bytes_accessed=bytes_accessed),
    )


def fcnet_forward(x, params, *, tile_n=1024):
    """FcNet forward. x: (images, patches, 14) -> (images, patches, 14).

    tile_n: batch columns per grid step (multiple of 128).  1024 is a safe default on v7x
    (64 MiB VMEM); 2048 works on v5e/v6e (128 MiB).  Per-step VMEM is tiny (~16*tile_n*4 B
    per buffer), so the choice mostly trades per-step overhead vs. pipeline depth.
    """
    images, patches, values = x.shape
    assert values == C, "FcNet operates on 14 features"
    n = images * patches
    n_tiles = pl.cdiv(n, tile_n)
    n_pad = n_tiles * tile_n

    # Lane-dense layout: channels on sublanes, batch on lanes; zero-pad batch to the tile grid.
    xt = x.reshape(n, C).T.astype(jnp.float32)                 # (C, n)
    xt = jnp.pad(xt, ((0, 0), (0, n_pad - n)))                 # (C, n_pad)
    nreal = jnp.array([n], jnp.int32)

    layer_call_first = _build_layer_call(n_pad, tile_n, first=True)
    layer_call_rest = _build_layer_call(n_pad, tile_n, first=False)
    final_call = _build_final_call(n_pad, tile_n)

    inv_n = jnp.float32(1.0 / n)
    scale = jnp.ones((C, 1), jnp.float32)      # unused by the first layer
    shift = jnp.zeros((C, 1), jnp.float32)

    z = xt
    for l in range(6):
        call = layer_call_first if l == 0 else layer_call_rest
        z, s, ss = call(nreal, z, scale, shift, params['w'][l])
        # Fold BatchNorm1d (training-mode batch stats, biased variance) into scale/shift
        # that the *next* kernel applies.  Tiny (14,1) host-side math between calls.
        mean = s * inv_n
        var = jnp.maximum(ss * inv_n - mean * mean, 0.0)
        inv_std = lax.rsqrt(var + EPS)
        scale = params['gamma'][l].reshape(C, 1) * inv_std
        shift = params['beta'][l].reshape(C, 1) - mean * scale

    out = final_call(z, scale, shift, params['w_out'], params['b_out'].reshape(C, 1))
    return out[:, :n].T.reshape(images, patches, C)


def fcnet_reference(x, params):
    """Pure-JAX reference mirroring the PyTorch forward (training-mode BatchNorm1d)."""
    images, patches, values = x.shape
    h = x.astype(jnp.float32)
    for l in range(6):
        h = jnp.einsum('ipk,ck->ipc', h, params['w'][l])            # Linear, no bias
        flat = h.reshape(images * patches, values)
        mean = flat.mean(axis=0)
        var = ((flat - mean) ** 2).mean(axis=0)                     # biased variance
        flat = (flat - mean) / jnp.sqrt(var + EPS) * params['gamma'][l] + params['beta'][l]
        h = jnp.maximum(flat, 0.0).reshape(images, patches, values)
    return jnp.einsum('ipk,ck->ipc', h, params['w_out']) + params['b_out']


# TODO(synk): training-mode BatchNorm1d also updates running_mean/running_var buffers as a
# module side effect; only the forward output is computed here.

if __name__ == "__main__":
    key = jax.random.PRNGKey(0)
    ks = jax.random.split(key, 6)

    images, patches = 2, 150          # N = 300 rows -> 3 grid steps at tile_n=128 (w/ padding)
    params = {
        'w':     jax.random.normal(ks[0], (6, C, C), jnp.float32) / jnp.sqrt(float(C)),
        'gamma': 1.0 + 0.1 * jax.random.normal(ks[1], (6, C), jnp.float32),
        'beta':  0.1 * jax.random.normal(ks[2], (6, C), jnp.float32),
        'w_out': jax.random.normal(ks[3], (C, C), jnp.float32) / jnp.sqrt(float(C)),
        'b_out': 0.1 * jax.random.normal(ks[4], (C,), jnp.float32),
    }
    x = jax.random.normal(ks[5], (images, patches, C), jnp.float32)

    fwd = jax.jit(functools.partial(fcnet_forward, tile_n=128))
    out = fwd(x, params)
    jax.block_until_ready(out)

    ref = fcnet_reference(x, params)
    assert out.shape == (images, patches, C)
    max_err = float(jnp.max(jnp.abs(out - ref)))
    assert max_err < 1e-2, f"mismatch vs reference: {max_err}"

    print("KERNEL_OK")
</pallas_src>

<mosaic_0001>
module attributes {stable_mosaic.version = 11 : i64} {
  func.func @_layer_kernel(%arg0: i32, %arg1: memref<1xi32, #tpu.memory_space<smem>>, %arg2: memref<14x128xf32, #tpu.memory_space<vmem>>, %arg3: memref<14x1xf32, #tpu.memory_space<vmem>>, %arg4: memref<14x1xf32, #tpu.memory_space<vmem>>, %arg5: memref<14x14xf32, #tpu.memory_space<vmem>>, %arg6: memref<14x128xf32, #tpu.memory_space<vmem>>, %arg7: memref<14x1xf32, #tpu.memory_space<vmem>>, %arg8: memref<14x1xf32, #tpu.memory_space<vmem>>) attributes {dimension_semantics = [#tpu.dimension_semantics<arbitrary>], iteration_bounds = array<i64: 3>, scalar_prefetch = 1 : i64, scratch_operands = 0 : i64, tpu.core_type = #tpu.core_type<tc>, window_params = [{transform_indices = @transform_0, window_bounds = array<i64: 14, 128>}, {pipeline_mode = #tpu.pipeline_mode<synchronous>, transform_indices = @transform_1, window_bounds = array<i64: 14, 1>}, {pipeline_mode = #tpu.pipeline_mode<synchronous>, transform_indices = @transform_2, window_bounds = array<i64: 14, 1>}, {pipeline_mode = #tpu.pipeline_mode<synchronous>, transform_indices = @transform_3, window_bounds = array<i64: 14, 14>}, {transform_indices = @transform_4, window_bounds = array<i64: 14, 128>}, {pipeline_mode = #tpu.pipeline_mode<synchronous>, transform_indices = @transform_5, window_bounds = array<i64: 14, 1>}, {pipeline_mode = #tpu.pipeline_mode<synchronous>, transform_indices = @transform_6, window_bounds = array<i64: 14, 1>}]} {
    %c0_i32 = arith.constant 0 : i32
    %0 = arith.cmpi eq, %arg0, %c0_i32 : i32
    %1 = arith.extui %0 : i1 to i32
    %c0_i32_0 = arith.constant 0 : i32
    %2 = arith.cmpi ne, %1, %c0_i32_0 : i32
    scf.if %2 {
      %cst_18 = arith.constant 0.000000e+00 : f32
      %29 = vector.broadcast %cst_18 : f32 to vector<14x1xf32>
      %c0_19 = arith.constant 0 : index
      %c0_20 = arith.constant 0 : index
      %30 = vector.load %arg7[%c0_19, %c0_20] : memref<14x1xf32, #tpu.memory_space<vmem>>, vector<14x1xf32>
      tpu.vector_store %arg7[%c0_19, %c0_20], %29 {strides = array<i32>} : memref<14x1xf32, #tpu.memory_space<vmem>>, vector<14x1xf32>,
      %cst_21 = arith.constant 0.000000e+00 : f32
      %31 = vector.broadcast %cst_21 : f32 to vector<14x1xf32>
      %c0_22 = arith.constant 0 : index
      %c0_23 = arith.constant 0 : index
      %32 = vector.load %arg8[%c0_22, %c0_23] : memref<14x1xf32, #tpu.memory_space<vmem>>, vector<14x1xf32>
      tpu.vector_store %arg8[%c0_22, %c0_23], %31 {strides = array<i32>} : memref<14x1xf32, #tpu.memory_space<vmem>>, vector<14x1xf32>,
    } else {
    }
    %c0 = arith.constant 0 : index
    %c0_1 = arith.constant 0 : index
    %3 = vector.load %arg2[%c0, %c0_1] : memref<14x128xf32, #tpu.memory_space<vmem>>, vector<14x128xf32>
    %4 = tpu.iota {dimensions = array<i32: 1>} : vector<1x128xi32>
    %c128_i32 = arith.constant 128 : i32
    %5 = arith.muli %arg0, %c128_i32 : i32
    %6 = vector.broadcast %5 : i32 to vector<1x128xi32>
    %7 = arith.addi %4, %6 : vector<1x128xi32>
    %c0_2 = arith.constant 0 : index
    %8 = memref.load %arg1[%c0_2] : memref<1xi32, #tpu.memory_space<smem>>
    %9 = vector.broadcast %8 : i32 to vector<1x128xi32>
    %10 = arith.cmpi slt, %7, %9 : vector<1x128xi32>
    %cst = arith.constant 0.000000e+00 : f32
    %11 = vector.shape_cast %10 : vector<1x128xi1> to vector<1x128xi1>
    %12 = vector.broadcast %11 : vector<1x128xi1> to vector<14x128xi1>
    %13 = vector.broadcast %cst : f32 to vector<14x128xf32>
    %14 = arith.select %12, %3, %13 : vector<14x128xi1>, vector<14x128xf32>
    %c0_3 = arith.constant 0 : index
    %c0_4 = arith.constant 0 : index
    %15 = vector.load %arg5[%c0_3, %c0_4] : memref<14x14xf32, #tpu.memory_space<vmem>>, vector<14x14xf32>
    %cst_5 = arith.constant dense<0.000000e+00> : vector<14x128xf32>
    %16 = tpu.matmul %15, %14, %cst_5 {dimension_numbers = #tpu.dot_dimension_numbers<[1], [0], [0], [1], [0, 0, 1, 1], [], []>} : vector<14x14xf32>, vector<14x128xf32>, vector<14x128xf32> -> vector<14x128xf32>
    %c0_6 = arith.constant 0 : index
    %c0_7 = arith.constant 0 : index
    %17 = vector.load %arg6[%c0_6, %c0_7] : memref<14x128xf32, #tpu.memory_space<vmem>>, vector<14x128xf32>
    tpu.vector_store %arg6[%c0_6, %c0_7], %16 {strides = array<i32>} : memref<14x128xf32, #tpu.memory_space<vmem>>, vector<14x128xf32>,
    %c0_8 = arith.constant 0 : index
    %c0_9 = arith.constant 0 : index
    %18 = vector.load %arg7[%c0_8, %c0_9] : memref<14x1xf32, #tpu.memory_space<vmem>>, vector<14x1xf32>
    %cst_10 = arith.constant dense<0.000000e+00> : vector<14xf32>
    %19 = vector.multi_reduction <add>, %16, %cst_10 [1] : vector<14x128xf32> to vector<14xf32>
    %20 = vector.shape_cast %19 : vector<14xf32> to vector<14x1xf32>
    %21 = arith.addf %18, %20 : vector<14x1xf32>
    %c0_11 = arith.constant 0 : index
    %c0_12 = arith.constant 0 : index
    %22 = vector.load %arg7[%c0_11, %c0_12] : memref<14x1xf32, #tpu.memory_space<vmem>>, vector<14x1xf32>
    tpu.vector_store %arg7[%c0_11, %c0_12], %21 {strides = array<i32>} : memref<14x1xf32, #tpu.memory_space<vmem>>, vector<14x1xf32>,
    %c0_13 = arith.constant 0 : index
    %c0_14 = arith.constant 0 : index
    %23 = vector.load %arg8[%c0_13, %c0_14] : memref<14x1xf32, #tpu.memory_space<vmem>>, vector<14x1xf32>
    %24 = arith.mulf %16, %16 : vector<14x128xf32>
    %cst_15 = arith.constant dense<0.000000e+00> : vector<14xf32>
    %25 = vector.multi_reduction <add>, %24, %cst_15 [1] : vector<14x128xf32> to vector<14xf32>
    %26 = vector.shape_cast %25 : vector<14xf32> to vector<14x1xf32>
    %27 = arith.addf %23, %26 : vector<14x1xf32>
    %c0_16 = arith.constant 0 : index
    %c0_17 = arith.constant 0 : index
    %28 = vector.load %arg8[%c0_16, %c0_17] : memref<14x1xf32, #tpu.memory_space<vmem>>, vector<14x1xf32>
    tpu.vector_store %arg8[%c0_16, %c0_17], %27 {strides = array<i32>} : memref<14x1xf32, #tpu.memory_space<vmem>>, vector<14x1xf32>,
    return
  }
  func.func @transform_0(%arg0: i32, %arg1: memref<1xi32, #tpu.memory_space<smem>>) -> (i32, i32) {
    %c0_i32 = arith.constant 0 : i32
    %c0_i32_0 = arith.constant 0 : i32
    return %c0_i32, %arg0 : i32, i32
  }
  func.func @transform_1(%arg0: i32, %arg1: memref<1xi32, #tpu.memory_space<smem>>) -> (i32, i32) {
    %c0_i32 = arith.constant 0 : i32
    %c0_i32_0 = arith.constant 0 : i32
    %c0_i32_1 = arith.constant 0 : i32
    return %c0_i32, %c0_i32_0 : i32, i32
  }
  func.func @transform_2(%arg0: i32, %arg1: memref<1xi32, #tpu.memory_space<smem>>) -> (i32, i32) {
    %c0_i32 = arith.constant 0 : i32
    %c0_i32_0 = arith.constant 0 : i32
    %c0_i32_1 = arith.constant 0 : i32
    return %c0_i32, %c0_i32_0 : i32, i32
  }
  func.func @transform_3(%arg0: i32, %arg1: memref<1xi32, #tpu.memory_space<smem>>) -> (i32, i32) {
    %c0_i32 = arith.constant 0 : i32
    %c0_i32_0 = arith.constant 0 : i32
    %c0_i32_1 = arith.constant 0 : i32
    return %c0_i32, %c0_i32_0 : i32, i32
  }
  func.func @transform_4(%arg0: i32, %arg1: memref<1xi32, #tpu.memory_space<smem>>) -> (i32, i32) {
    %c0_i32 = arith.constant 0 : i32
    %c0_i32_0 = arith.constant 0 : i32
    return %c0_i32, %arg0 : i32, i32
  }
  func.func @transform_5(%arg0: i32, %arg1: memref<1xi32, #tpu.memory_space<smem>>) -> (i32, i32) {
    %c0_i32 = arith.constant 0 : i32
    %c0_i32_0 = arith.constant 0 : i32
    %c0_i32_1 = arith.constant 0 : i32
    return %c0_i32, %c0_i32_0 : i32, i32
  }
  func.func @transform_6(%arg0: i32, %arg1: memref<1xi32, #tpu.memory_space<smem>>) -> (i32, i32) {
    %c0_i32 = arith.constant 0 : i32
    %c0_i32_0 = arith.constant 0 : i32
    %c0_i32_1 = arith.constant 0 : i32
    return %c0_i32, %c0_i32_0 : i32, i32
  }
}

module attributes {stable_mosaic.version = 11 : i64} {
  func.func @_final_kernel(%arg0: i32, %arg1: memref<14x128xf32, #tpu.memory_space<vmem>>, %arg2: memref<14x1xf32, #tpu.memory_space<vmem>>, %arg3: memref<14x1xf32, #tpu.memory_space<vmem>>, %arg4: memref<14x14xf32, #tpu.memory_space<vmem>>, %arg5: memref<14x1xf32, #tpu.memory_space<vmem>>, %arg6: memref<14x128xf32, #tpu.memory_space<vmem>>) attributes {dimension_semantics = [#tpu.dimension_semantics<parallel>], iteration_bounds = array<i64: 3>, scalar_prefetch = 0 : i64, scratch_operands = 0 : i64, tpu.core_type = #tpu.core_type<tc>, window_params = [{transform_indices = @transform_0, window_bounds = array<i64: 14, 128>}, {pipeline_mode = #tpu.pipeline_mode<synchronous>, transform_indices = @transform_1, window_bounds = array<i64: 14, 1>}, {pipeline_mode = #tpu.pipeline_mode<synchronous>, transform_indices = @transform_2, window_bounds = array<i64: 14, 1>}, {pipeline_mode = #tpu.pipeline_mode<synchronous>, transform_indices = @transform_3, window_bounds = array<i64: 14, 14>}, {pipeline_mode = #tpu.pipeline_mode<synchronous>, transform_indices = @transform_4, window_bounds = array<i64: 14, 1>}, {transform_indices = @transform_5, window_bounds = array<i64: 14, 128>}]} {
    %c0 = arith.constant 0 : index
    %c0_0 = arith.constant 0 : index
    %0 = vector.load %arg1[%c0, %c0_0] : memref<14x128xf32, #tpu.memory_space<vmem>>, vector<14x128xf32>
    %c0_1 = arith.constant 0 : index
    %c0_2 = arith.constant 0 : index
    %1 = vector.load %arg2[%c0_1, %c0_2] : memref<14x1xf32, #tpu.memory_space<vmem>>, vector<14x1xf32>
    %2 = vector.broadcast %1 : vector<14x1xf32> to vector<14x128xf32>
    %3 = arith.mulf %0, %2 : vector<14x128xf32>
    %c0_3 = arith.constant 0 : index
    %c0_4 = arith.constant 0 : index
    %4 = vector.load %arg3[%c0_3, %c0_4] : memref<14x1xf32, #tpu.memory_space<vmem>>, vector<14x1xf32>
    %5 = vector.broadcast %4 : vector<14x1xf32> to vector<14x128xf32>
    %6 = arith.addf %3, %5 : vector<14x128xf32>
    %cst = arith.constant 0.000000e+00 : f32
    %7 = vector.broadcast %cst : f32 to vector<14x128xf32>
    %8 = arith.maximumf %6, %7 : vector<14x128xf32>
    %c0_5 = arith.constant 0 : index
    %c0_6 = arith.constant 0 : index
    %9 = vector.load %arg4[%c0_5, %c0_6] : memref<14x14xf32, #tpu.memory_space<vmem>>, vector<14x14xf32>
    %cst_7 = arith.constant dense<0.000000e+00> : vector<14x128xf32>
    %10 = tpu.matmul %9, %8, %cst_7 {dimension_numbers = #tpu.dot_dimension_numbers<[1], [0], [0], [1], [0, 0, 1, 1], [], []>} : vector<14x14xf32>, vector<14x128xf32>, vector<14x128xf32> -> vector<14x128xf32>
    %c0_8 = arith.constant 0 : index
    %c0_9 = arith.constant 0 : index
    %11 = vector.load %arg5[%c0_8, %c0_9] : memref<14x1xf32, #tpu.memory_space<vmem>>, vector<14x1xf32>
    %12 = vector.broadcast %11 : vector<14x1xf32> to vector<14x128xf32>
    %13 = arith.addf %10, %12 : vector<14x128xf32>
    %c0_10 = arith.constant 0 : index
    %c0_11 = arith.constant 0 : index
    %14 = vector.load %arg6[%c0_10, %c0_11] : memref<14x128xf32, #tpu.memory_space<vmem>>, vector<14x128xf32>
    tpu.vector_store %arg6[%c0_10, %c0_11], %13 {strides = array<i32>} : memref<14x128xf32, #tpu.memory_space<vmem>>, vector<14x128xf32>,
    return
  }
  func.func @transform_0(%arg0: i32) -> (i32, i32) {
    %c0_i32 = arith.constant 0 : i32
    %c0_i32_0 = arith.constant 0 : i32
    return %c0_i32, %arg0 : i32, i32
  }
  func.func @transform_1(%arg0: i32) -> (i32, i32) {
    %c0_i32 = arith.constant 0 : i32
    %c0_i32_0 = arith.constant 0 : i32
    %c0_i32_1 = arith.constant 0 : i32
    return %c0_i32, %c0_i32_0 : i32, i32
  }
  func.func @transform_2(%arg0: i32) -> (i32, i32) {
    %c0_i32 = arith.constant 0 : i32
    %c0_i32_0 = arith.constant 0 : i32
    %c0_i32_1 = arith.constant 0 : i32
    return %c0_i32, %c0_i32_0 : i32, i32
  }
  func.func @transform_3(%arg0: i32) -> (i32, i32) {
    %c0_i32 = arith.constant 0 : i32
    %c0_i32_0 = arith.constant 0 : i32
    %c0_i32_1 = arith.constant 0 : i32
    return %c0_i32, %c0_i32_0 : i32, i32
  }
  func.func @transform_4(%arg0: i32) -> (i32, i32) {
    %c0_i32 = arith.constant 0 : i32
    %c0_i32_0 = arith.constant 0 : i32
    %c0_i32_1 = arith.constant 0 : i32
    return %c0_i32, %c0_i32_0 : i32, i32
  }
  func.func @transform_5(%arg0: i32) -> (i32, i32) {
    %c0_i32 = arith.constant 0 : i32
    %c0_i32_0 = arith.constant 0 : i32
    return %c0_i32, %arg0 : i32, i32
  }
}

module attributes {stable_mosaic.version = 11 : i64} {
  func.func @_layer_kernel(%arg0: i32, %arg1: memref<1xi32, #tpu.memory_space<smem>>, %arg2: memref<14x128xf32, #tpu.memory_space<vmem>>, %arg3: memref<14x1xf32, #tpu.memory_space<vmem>>, %arg4: memref<14x1xf32, #tpu.memory_space<vmem>>, %arg5: memref<14x14xf32, #tpu.memory_space<vmem>>, %arg6: memref<14x128xf32, #tpu.memory_space<vmem>>, %arg7: memref<14x1xf32, #tpu.memory_space<vmem>>, %arg8: memref<14x1xf32, #tpu.memory_space<vmem>>) attributes {dimension_semantics = [#tpu.dimension_semantics<arbitrary>], iteration_bounds = array<i64: 3>, scalar_prefetch = 1 : i64, scratch_operands = 0 : i64, tpu.core_type = #tpu.core_type<tc>, window_params = [{transform_indices = @transform_0, window_bounds = array<i64: 14, 128>}, {pipeline_mode = #tpu.pipeline_mode<synchronous>, transform_indices = @transform_1, window_bounds = array<i64: 14, 1>}, {pipeline_mode = #tpu.pipeline_mode<synchronous>, transform_indices = @transform_2, window_bounds = array<i64: 14, 1>}, {pipeline_mode = #tpu.pipeline_mode<synchronous>, transform_indices = @transform_3, window_bounds = array<i64: 14, 14>}, {transform_indices = @transform_4, window_bounds = array<i64: 14, 128>}, {pipeline_mode = #tpu.pipeline_mode<synchronous>, transform_indices = @transform_5, window_bounds = array<i64: 14, 1>}, {pipeline_mode = #tpu.pipeline_mode<synchronous>, transform_indices = @transform_6, window_bounds = array<i64: 14, 1>}]} {
    %c0_i32 = arith.constant 0 : i32
    %0 = arith.cmpi eq, %arg0, %c0_i32 : i32
    %1 = arith.extui %0 : i1 to i32
    %c0_i32_0 = arith.constant 0 : i32
    %2 = arith.cmpi ne, %1, %c0_i32_0 : i32
    scf.if %2 {
      %cst_23 = arith.constant 0.000000e+00 : f32
      %37 = vector.broadcast %cst_23 : f32 to vector<14x1xf32>
      %c0_24 = arith.constant 0 : index
      %c0_25 = arith.constant 0 : index
      %38 = vector.load %arg7[%c0_24, %c0_25] : memref<14x1xf32, #tpu.memory_space<vmem>>, vector<14x1xf32>
      tpu.vector_store %arg7[%c0_24, %c0_25], %37 {strides = array<i32>} : memref<14x1xf32, #tpu.memory_space<vmem>>, vector<14x1xf32>,
      %cst_26 = arith.constant 0.000000e+00 : f32
      %39 = vector.broadcast %cst_26 : f32 to vector<14x1xf32>
      %c0_27 = arith.constant 0 : index
      %c0_28 = arith.constant 0 : index
      %40 = vector.load %arg8[%c0_27, %c0_28] : memref<14x1xf32, #tpu.memory_space<vmem>>, vector<14x1xf32>
      tpu.vector_store %arg8[%c0_27, %c0_28], %39 {strides = array<i32>} : memref<14x1xf32, #tpu.memory_space<vmem>>, vector<14x1xf32>,
    } else {
    }
    %c0 = arith.constant 0 : index
    %c0_1 = arith.constant 0 : index
    %3 = vector.load %arg2[%c0, %c0_1] : memref<14x128xf32, #tpu.memory_space<vmem>>, vector<14x128xf32>
    %c0_2 = arith.constant 0 : index
    %c0_3 = arith.constant 0 : index
    %4 = vector.load %arg3[%c0_2, %c0_3] : memref<14x1xf32, #tpu.memory_space<vmem>>, vector<14x1xf32>
    %5 = vector.broadcast %4 : vector<14x1xf32> to vector<14x128xf32>
    %6 = arith.mulf %3, %5 : vector<14x128xf32>
    %c0_4 = arith.constant 0 : index
    %c0_5 = arith.constant 0 : index
    %7 = vector.load %arg4[%c0_4, %c0_5] : memref<14x1xf32, #tpu.memory_space<vmem>>, vector<14x1xf32>
    %8 = vector.broadcast %7 : vector<14x1xf32> to vector<14x128xf32>
    %9 = arith.addf %6, %8 : vector<14x128xf32>
    %cst = arith.constant 0.000000e+00 : f32
    %10 = vector.broadcast %cst : f32 to vector<14x128xf32>
    %11 = arith.maximumf %9, %10 : vector<14x128xf32>
    %12 = tpu.iota {dimensions = array<i32: 1>} : vector<1x128xi32>
    %c128_i32 = arith.constant 128 : i32
    %13 = arith.muli %arg0, %c128_i32 : i32
    %14 = vector.broadcast %13 : i32 to vector<1x128xi32>
    %15 = arith.addi %12, %14 : vector<1x128xi32>
    %c0_6 = arith.constant 0 : index
    %16 = memref.load %arg1[%c0_6] : memref<1xi32, #tpu.memory_space<smem>>
    %17 = vector.broadcast %16 : i32 to vector<1x128xi32>
    %18 = arith.cmpi slt, %15, %17 : vector<1x128xi32>
    %cst_7 = arith.constant 0.000000e+00 : f32
    %19 = vector.shape_cast %18 : vector<1x128xi1> to vector<1x128xi1>
    %20 = vector.broadcast %19 : vector<1x128xi1> to vector<14x128xi1>
    %21 = vector.broadcast %cst_7 : f32 to vector<14x128xf32>
    %22 = arith.select %20, %11, %21 : vector<14x128xi1>, vector<14x128xf32>
    %c0_8 = arith.constant 0 : index
    %c0_9 = arith.constant 0 : index
    %23 = vector.load %arg5[%c0_8, %c0_9] : memref<14x14xf32, #tpu.memory_space<vmem>>, vector<14x14xf32>
    %cst_10 = arith.constant dense<0.000000e+00> : vector<14x128xf32>
    %24 = tpu.matmul %23, %22, %cst_10 {dimension_numbers = #tpu.dot_dimension_numbers<[1], [0], [0], [1], [0, 0, 1, 1], [], []>} : vector<14x14xf32>, vector<14x128xf32>, vector<14x128xf32> -> vector<14x128xf32>
    %c0_11 = arith.constant 0 : index
    %c0_12 = arith.constant 0 : index
    %25 = vector.load %arg6[%c0_11, %c0_12] : memref<14x128xf32, #tpu.memory_space<vmem>>, vector<14x128xf32>
    tpu.vector_store %arg6[%c0_11, %c0_12], %24 {strides = array<i32>} : memref<14x128xf32, #tpu.memory_space<vmem>>, vector<14x128xf32>,
    %c0_13 = arith.constant 0 : index
    %c0_14 = arith.constant 0 : index
    %26 = vector.load %arg7[%c0_13, %c0_14] : memref<14x1xf32, #tpu.memory_space<vmem>>, vector<14x1xf32>
    %cst_15 = arith.constant dense<0.000000e+00> : vector<14xf32>
    %27 = vector.multi_reduction <add>, %24, %cst_15 [1] : vector<14x128xf32> to vector<14xf32>
    %28 = vector.shape_cast %27 : vector<14xf32> to vector<14x1xf32>
    %29 = arith.addf %26, %28 : vector<14x1xf32>
    %c0_16 = arith.constant 0 : index
    %c0_17 = arith.constant 0 : index
    %30 = vector.load %arg7[%c0_16, %c0_17] : memref<14x1xf32, #tpu.memory_space<vmem>>, vector<14x1xf32>
    tpu.vector_store %arg7[%c0_16, %c0_17], %29 {strides = array<i32>} : memref<14x1xf32, #tpu.memory_space<vmem>>, vector<14x1xf32>,
    %c0_18 = arith.constant 0 : index
    %c0_19 = arith.constant 0 : index
    %31 = vector.load %arg8[%c0_18, %c0_19] : memref<14x1xf32, #tpu.memory_space<vmem>>, vector<14x1xf32>
    %32 = arith.mulf %24, %24 : vector<14x128xf32>
    %cst_20 = arith.constant dense<0.000000e+00> : vector<14xf32>
    %33 = vector.multi_reduction <add>, %32, %cst_20 [1] : vector<14x128xf32> to vector<14xf32>
    %34 = vector.shape_cast %33 : vector<14xf32> to vector<14x1xf32>
    %35 = arith.addf %31, %34 : vector<14x1xf32>
    %c0_21 = arith.constant 0 : index
    %c0_22 = arith.constant 0 : index
    %36 = vector.load %arg8[%c0_21, %c0_22] : memref<14x1xf32, #tpu.memory_space<vmem>>, vector<14x1xf32>
    tpu.vector_store %arg8[%c0_21, %c0_22], %35 {strides = array<i32>} : memref<14x1xf32, #tpu.memory_space<vmem>>, vector<14x1xf32>,
    return
  }
  func.func @transform_0(%arg0: i32, %arg1: memref<1xi32, #tpu.memory_space<smem>>) -> (i32, i32) {
    %c0_i32 = arith.constant 0 : i32
    %c0_i32_0 = arith.constant 0 : i32
    return %c0_i32, %arg0 : i32, i32
  }
  func.func @transform_1(%arg0: i32, %arg1: memref<1xi32, #tpu.memory_space<smem>>) -> (i32, i32) {
    %c0_i32 = arith.constant 0 : i32
    %c0_i32_0 = arith.constant 0 : i32
    %c0_i32_1 = arith.constant 0 : i32
    return %c0_i32, %c0_i32_0 : i32, i32
  }
  func.func @transform_2(%arg0: i32, %arg1: memref<1xi32, #tpu.memory_space<smem>>) -> (i32, i32) {
    %c0_i32 = arith.constant 0 : i32
    %c0_i32_0 = arith.constant 0 : i32
    %c0_i32_1 = arith.constant 0 : i32
    return %c0_i32, %c0_i32_0 : i32, i32
  }
  func.func @transform_3(%arg0: i32, %arg1: memref<1xi32, #tpu.memory_space<smem>>) -> (i32, i32) {
    %c0_i32 = arith.constant 0 : i32
    %c0_i32_0 = arith.constant 0 : i32
    %c0_i32_1 = arith.constant 0 : i32
    return %c0_i32, %c0_i32_0 : i32, i32
  }
  func.func @transform_4(%arg0: i32, %arg1: memref<1xi32, #tpu.memory_space<smem>>) -> (i32, i32) {
    %c0_i32 = arith.constant 0 : i32
    %c0_i32_0 = arith.constant 0 : i32
    return %c0_i32, %arg0 : i32, i32
  }
  func.func @transform_5(%arg0: i32, %arg1: memref<1xi32, #tpu.memory_space<smem>>) -> (i32, i32) {
    %c0_i32 = arith.constant 0 : i32
    %c0_i32_0 = arith.constant 0 : i32
    %c0_i32_1 = arith.constant 0 : i32
    return %c0_i32, %c0_i32_0 : i32, i32
  }
  func.func @transform_6(%arg0: i32, %arg1: memref<1xi32, #tpu.memory_space<smem>>) -> (i32, i32) {
    %c0_i32 = arith.constant 0 : i32
    %c0_i32_0 = arith.constant 0 : i32
    %c0_i32_1 = arith.constant 0 : i32
    return %c0_i32, %c0_i32_0 : i32, i32
  }
}

</mosaic_0001>

<bundles_post_ra>
// kernel: fcnet_forward.7
= control target key start
LH: loop header
LB: loop body
LE: loop exit
PB: predicated region body
PF: predicated region fallthrough
CT: control target
= control target key end

     0   :  { %s766_s0 = inlined_call_operand.<no memory space> [shape: s32[1], index: 0, kind: input, shape index: {}]   ;;  %s767_s1 = inlined_call_operand.vmem [shape: f32[14,384], index: 1, kind: input, shape index: {}]   ;;  %s768_s2 = inlined_call_operand.vmem [shape: f32[14,1], index: 2, kind: input, shape index: {}]   ;;  %s769_s3 = inlined_call_operand.vmem [shape: f32[14,1], index: 3, kind: input, shape index: {}]   ;;  %s770_s4 = inlined_call_operand.vmem [shape: f32[14,14], index: 4, kind: input, shape index: {}]   ;;  %s771_s5 = inlined_call_operand.vmem [shape: f32[14,384], index: 5, kind: output, shape index: {0}]   ;;  %s772_s6 = inlined_call_operand.vmem [shape: f32[14,1], index: 6, kind: output, shape index: {1}]   ;;  %s773_s7 = inlined_call_operand.vmem [shape: f32[14,1], index: 7, kind: output, shape index: {2}]  }
   0x1   :  { %13 = sst [smem:[#allocation3]] %s766_s0 }
   0x2   :  { %s663_s2 = smov 0   ;;  %s665_s26 = smov 0  }
   0x3   :  { %s667_s3 = smov 0  }
   0x4 LB: > { %s676_s0 = sadd.s32 4294967295, %s617_s3   ;;  %s678_s27 = sadd.s32 1, %s617_s3   ;;  %s617_s3 = sphi %s667_s3, %s777_s3   ;;  %s613_s26 = sphi %s665_s26, %s776_s26   ;;  %s609_s2 = sphi %s663_s2, %s775_s2  }
   0x5   : > { %s23_s28 = ssub.s32 %s617_s3, %s678_s27  ;;  %s26_s29 = sadd.s32 1, %s613_s26 }
   0x6   : > { %p24_p0 = scmp.eq.s32.totalorder %s23_s28, 0  ;;  %p33_p1 = scmp.ne.s32.totalorder %s613_s26, %s609_s2 }
   0x7   : > { %p34_p2 = scmp.eq.s32.totalorder %s617_s3, 0  ;;  %p126_p3 = scmp.eq.s32.totalorder %s676_s0, 2 }
   0x8   : > { %s686_s30 = scalar_select %p24_p0, %s613_s26, %s26_s29  }
   0x9   : > { %p35_p4 = por %p34_p2, %p33_p1  ;;  %p688_p5 = por %p126_p3, %p33_p1 }
   0xa   : > { %p537_p6 = scmp.ge.s32.totalorder %s617_s3, 3 }
   0xc   : > { %199 = sbr.rel (%p537_p6) target bundleno = 26 (0x1a), region = 28 }
  0x13   : > { %202 = sbr.rel (!%p35_p4) target bundleno = 26 (0x1a), region = 32  ;;  %s204_s9 = sand.u32 (%p35_p4), 1, %s613_s26  }
  0x14   : > { %s539_s10 = sshll.u32 (%p35_p4), %s617_s3, 3  ;;  %s538_s11 = sshll.u32 (%p35_p4), %s204_s9, 4 }
  0x15   : > { %s208_s14 = scalar_lea.vmem (%p35_p4), %s767_s1, %s539_s10  ;;  %s206_s15 = scalar_lea.vmem (%p35_p4), [#allocation4], %s538_s11 }
  0x16   : > { %v238_v0 = vld [vmem:[%s208_s14] sm:$0xff] (%p35_p4)  ;;  %v240_v1 = vld [vmem:[%s208_s14 + $0x18] sm:$0xff] (%p35_p4) }
  0x17   : > { %239 = vst [vmem:[%s206_s15] sm:$0xff] (%p35_p4), %v238_v0  ;;  %241 = vst [vmem:[%s206_s15 + $0x8] sm:$0xff] (%p35_p4), %v240_v1 }
  0x1a PF: > { %p540_p7 = scmp.ge.s32.totalorder %s617_s3, 1  ;;  %p246_p8 = scmp.lt.s32.totalorder %s617_s3, 4 }
  0x1c   : > { %p247_p9 = pnand %p540_p7, %p246_p8 }
  0x1d   : > { %s253_s16 = sand.u32 (!%p247_p9), 1, %s609_s2   ;;  %p543_p10 = scmp.ne.s32.totalorder (!%p247_p9), %s676_s0, 0 }
  0x1e   : > { %250 = sbr.rel (%p247_p9) target bundleno = 423 (0x1a7), region = 70  ;;  %s541_s17 = sshll.u32 (!%p247_p9), %s253_s16, 4 }
  0x1f   : > { %s255_s18 = scalar_lea.vmem (!%p247_p9), [#allocation4], %s541_s17  ;;  %s697_s19 = scalar_lea.vmem (!%p247_p9), [#allocation5], %s541_s17 }
  0x25   : > { %284 = sbr.rel (%p543_p10) target bundleno = 44 (0x2c), region = 78  ;;  %vm285_vm0 = vcmask (!%p543_p10), 7168   ;;  %vm287_vm1 = vcmask (!%p543_p10), 5120   ;;  %v619_v2 = vmov (!%p543_p10), 0.0  }
  0x26   : > { %286 = vst.msk [vmem:[%s772_s6] sm:$0xff] (!%p543_p10), %vm285_vm0, %v619_v2  ;;  %289 = vst.msk [vmem:[%s773_s7] sm:$0xff] (!%p543_p10), %vm285_vm0, %v619_v2 }
  0x27   : > { %288 = vst.msk [vmem:[%s772_s6 + $0x8] sm:$0x3f] (!%p543_p10), %vm287_vm1, %v619_v2  ;;  %290 = vst.msk [vmem:[%s773_s7 + $0x8] sm:$0x3f] (!%p543_p10), %vm287_vm1, %v619_v2 }
  0x2c PF: > { %v293_v3 = vlaneseq  ;;  %s544_s28 = sshll.u32 %s676_s0, 7  ;;  %s298_s29 = sld [smem:[#allocation3]]  ;;  %v305_v5 = vld [vmem:[%s770_s4] sm:$0xff]  ;;  %vm307_vm2 = vcmask 113664   ;;  %v292_v8 = vld [vmem:[%s255_s18 + $0x8] sm:$0x3f] }
  0x2d   : > { %v296_v4 = vstv %s544_s28  ;;  %561 = vmatprep.mubr.msk.f32.mxu0 %vm307_vm2, %v305_v5  ;;  %vm314_vm3 = vcmask 1045504   ;;  %v291_v9 = vld [vmem:[%s255_s18] sm:$0xff]  ;;  %v306_v13 = vld [vmem:[%s770_s4 + $0x8] sm:$0x3f]  ;;  %vm404_vm6 = vcmask 7168   ;;  %vm406_vm7 = vcmask 5120  }
  0x2e   : > { %v294_v6 = vand.u32 127, %v293_v3  ;;  %v395_v20 = vld [vmem:[%s772_s6] sm:$0xff]  ;;  %v396_v25 = vld [vmem:[%s772_s6 + $0x8] sm:$0x3f]  ;;  %s550_s9 = sshll.u32 (%p688_p5), %s676_s0, 3 }
  0x2f   : > { %v408_v22 = vld [vmem:[%s773_s7] sm:$0xff]  ;;  %v409_v28 = vld [vmem:[%s773_s7 + $0x8] sm:$0x3f]  ;;  %s429_s12 = scalar_lea.vmem (%p688_p5), %s771_s5, %s550_s9 }
  0x30   : > { %v297_v7 = vadd.s32 %v296_v4, %v294_v6 }
  0x32   : > { %v299_v10 = vstv %s298_s29 }
  0x33   : > { %vm300_vm4 = vcmp.lt.s32.totalorder %v297_v7, %v299_v10 }
  0x34   : > { %v304_v11 = vsel %vm300_vm4, %v292_v8, 0.0  ;;  %vm565_vm5 = vmpackc.low %vm314_vm3, %vm300_vm4 }
  0x35   : > { %v564_v12 = vpack.c.bf16 %v304_v11, %v291_v9 }
  0x37   : > { %566 = vmatprep.subr.msk.bf16.mxu0 %vm565_vm5, %v564_v12 }
  0x38   : > { %569 = vmatpush3.bf16.msk.msra.mxu0 %vm565_vm5, %v564_v12 }
  0x3b   : > { %562 = vmatmul.mubr.msk.f32.vlgmr.msra.gmra.mrb[0].mxu0 %vm307_vm2, %v306_v13 }
 0x10e   : > { %v563_v14 = vpop.f32.mrb[0].mxu0 }
 0x10f   : > { %394 = vst [vmem:[%s697_s19 + $0x8] sm:$0x3f] %v563_v14  ;;  %v384_v15 = vpop.f32.mrb[1].mxu0  ;;  %v411_v17 = vmul.f32 %v563_v14, %v563_v14  ;;  %v399_v18 = vsel %vm314_vm3, %v563_v14, 0.0 }
 0x110   : > { %393 = vst [vmem:[%s697_s19] sm:$0xff] %v384_v15  ;;  %397 = vadd.xlane.f32.xlu0 %v384_v15  ;;  %v410_v16 = vmul.f32 %v384_v15, %v384_v15 }
 0x111   : > { %v414_v19 = vsel %vm314_vm3, %v411_v17, 0.0 }
 0x112   : > { %412 = vadd.xlane.f32.xlu1 %v410_v16 }
 0x114   : > { %400 = vadd.xlane.f32.xlu0 %v399_v18 }
 0x116   : > { %415 = vadd.xlane.f32.xlu1 %v414_v19  ;;  %v461_v33 = vld [vmem:[%s697_s19 + $0x8] sm:$0xff] (%p688_p5) }
 0x117   : > { %v459_v32 = vld [vmem:[%s697_s19] sm:$0xff] (%p688_p5)  ;;  %462 = vst [vmem:[%s429_s12 + $0x18] sm:$0xff] (%p688_p5), %v461_v33 }
 0x118   : > { %460 = vst [vmem:[%s429_s12] sm:$0xff] (%p688_p5), %v459_v32 }
 0x19d   : > { %v398_v21 = vpop.xlane.xlu0 %397 }
 0x19e   : > { %v402_v23 = vadd.f32 %v398_v21, %v395_v20 }
 0x19f   : > { %v413_v24 = vpop.xlane.xlu1 %412 }
 0x1a0   : > { %405 = vst.msk [vmem:[%s772_s6] sm:$0xff] %vm404_vm6, %v402_v23  ;;  %v417_v26 = vadd.f32 %v413_v24, %v408_v22  ;;  %427 = sbr.rel (!%p688_p5) target bundleno = 423 (0x1a7), region = 82 }
 0x1a1   : > { %v401_v27 = vpop.xlane.xlu0 %400 }
 0x1a2   : > { %419 = vst.msk [vmem:[%s773_s7] sm:$0xff] %vm404_vm6, %v417_v26  ;;  %v403_v29 = vadd.f32 %v401_v27, %v396_v25 }
 0x1a3   : > { %v416_v30 = vpop.xlane.xlu1 %415 }
 0x1a4   : > { %407 = vst.msk [vmem:[%s772_s6 + $0x8] sm:$0x3f] %vm406_vm7, %v403_v29  ;;  %v418_v31 = vadd.f32 %v416_v30, %v409_v28 }
 0x1a6   : > { %420 = vst.msk [vmem:[%s773_s7 + $0x8] sm:$0x3f] %vm406_vm7, %v418_v31 }
 0x1a7 PF: > { %p16_p11 = scmp.ge.s32.totalorder %s678_s27, 5   ;;  %s775_s2 = smov %s613_s26 }
 0x1a8   : > { %s776_s26 = smov %s686_s30  ;;  %s777_s3 = smov %s678_s27 }
 0x1a9   :  { %18 = sbr.rel (!%p16_p11) target bundleno = 4 (0x4), region = 167 }

// kernel: fcnet_forward.13
= control target key start
LH: loop header
LB: loop body
LE: loop exit
PB: predicated region body
PF: predicated region fallthrough
CT: control target
= control target key end

     0   :  { %s609_s18 = smov 0   ;;  %s611_s19 = smov 0   ;;  %s695_s0 = inlined_call_operand.vmem [shape: f32[14,384], index: 0, kind: input, shape index: {}]   ;;  %s696_s1 = inlined_call_operand.vmem [shape: f32[14,1], index: 1, kind: input, shape index: {}]   ;;  %s697_s2 = inlined_call_operand.vmem [shape: f32[14,1], index: 2, kind: input, shape index: {}]   ;;  %s698_s3 = inlined_call_operand.vmem [shape: f32[14,14], index: 3, kind: input, shape index: {}]   ;;  %s699_s4 = inlined_call_operand.vmem [shape: f32[14,1], index: 4, kind: input, shape index: {}]   ;;  %s700_s5 = inlined_call_operand.vmem [shape: f32[14,384], index: 5, kind: output, shape index: {}]  }
   0x1   :  { %s613_s20 = smov 0  }
   0x2 LB: > { %s492_s21 = sadd.s32 4294967295, %s575_s20   ;;  %s626_s22 = sadd.s32 1, %s575_s20   ;;  %s575_s20 = sphi %s613_s20, %s704_s20   ;;  %s571_s19 = sphi %s611_s19, %s703_s19   ;;  %s567_s18 = sphi %s609_s18, %s702_s18  }
   0x3   : > { %s19_s23 = ssub.s32 %s575_s20, %s626_s22  ;;  %s22_s24 = sadd.s32 1, %s571_s19 }
   0x4   : > { %p20_p0 = scmp.eq.s32.totalorder %s19_s23, 0  ;;  %p29_p1 = scmp.ne.s32.totalorder %s571_s19, %s567_s18 }
   0x5   : > { %p30_p2 = scmp.eq.s32.totalorder %s575_s20, 0  ;;  %p143_p3 = scmp.eq.s32.totalorder %s492_s21, 2 }
   0x6   : > { %s637_s25 = scalar_select %p20_p0, %s571_s19, %s22_s24  }
   0x7   : > { %p31_p4 = por %p30_p2, %p29_p1  ;;  %p639_p5 = por %p143_p3, %p29_p1 }
   0x8   : > { %p495_p6 = scmp.ge.s32.totalorder %s575_s20, 3 }
   0xa   : > { %177 = sbr.rel (%p495_p6) target bundleno = 24 (0x18), region = 32 }
  0x11   : > { %180 = sbr.rel (!%p31_p4) target bundleno = 24 (0x18), region = 36  ;;  %s182_s27 = sand.u32 (%p31_p4), 1, %s571_s19  }
  0x12   : > { %s497_s28 = sshll.u32 (%p31_p4), %s575_s20, 3  ;;  %s496_s29 = sshll.u32 (%p31_p4), %s182_s27, 4 }
  0x13   : > { %s186_s7 = scalar_lea.vmem (%p31_p4), %s695_s0, %s497_s28  ;;  %s184_s8 = scalar_lea.vmem (%p31_p4), [#allocation2], %s496_s29 }
  0x14   : > { %v216_v0 = vld [vmem:[%s186_s7] sm:$0xff] (%p31_p4)  ;;  %v218_v1 = vld [vmem:[%s186_s7 + $0x18] sm:$0xff] (%p31_p4) }
  0x15   : > { %217 = vst [vmem:[%s184_s8] sm:$0xff] (%p31_p4), %v216_v0  ;;  %219 = vst [vmem:[%s184_s8 + $0x8] sm:$0xff] (%p31_p4), %v218_v1 }
  0x18 PF: > { %p498_p7 = scmp.ge.s32.totalorder %s575_s20, 1  ;;  %p224_p8 = scmp.lt.s32.totalorder %s575_s20, 4 }
  0x1a   : > { %p225_p9 = pnand %p498_p7, %p224_p8 }
  0x1b   : > { %v273_v2 = vld [vmem:[%s697_s2] sm:$0xff] (!%p225_p9)  ;;  %v577_v4 = vmov (!%p225_p9), 0   ;;  %v274_v5 = vld [vmem:[%s697_s2 + $0x8] sm:$0x3f] (!%p225_p9)  ;;  %vm303_vm0 = vcmask (!%p225_p9), 113664   ;;  %s231_s30 = sand.u32 (!%p225_p9), 1, %s567_s18  }
  0x1c   : > { %228 = sbr.rel (%p225_p9) target bundleno = 397 (0x18d), region = 74  ;;  %v259_v3 = vld [vmem:[%s696_s1] sm:$0xff] (!%p225_p9)  ;;  %552 = vset.pattern.permute.xlu1 (!%p225_p9), %v577_v4  ;;  %551 = vset.pattern.permute.xlu0 (!%p225_p9), %v577_v4  ;;  %v260_v6 = vld [vmem:[%s696_s1 + $0x8] sm:$0x3f] (!%p225_p9)  ;;  %s499_s6 = sshll.u32 (!%p225_p9), %s231_s30, 4  ;;  %vm310_vm1 = vcmask (!%p225_p9), 1045504  }
  0x1d   : > { %277 = vperm.xlu1 (!%p225_p9), %552, %v273_v2   ;;  %263 = vperm.xlu0 (!%p225_p9), %551, %v259_v3   ;;  %v292_v7 = vld [vmem:[%s699_s4 + $0x8] sm:$0x3f] (!%p225_p9)  ;;  %v291_v8 = vld [vmem:[%s699_s4] sm:$0xff] (!%p225_p9)  ;;  %s233_s7 = scalar_lea.vmem (!%p225_p9), [#allocation2], %s499_s6  ;;  %vm578_vm2 = vmmov (!%p225_p9), 1   ;;  %s256_s9 = scalar_lea.vmem (!%p225_p9), [#allocation3], %s499_s6 }
  0x1e   : > { %v289_v9 = vld [vmem:[%s698_s3] sm:$0xff] (!%p225_p9)  ;;  %v258_v14 = vld [vmem:[%s233_s7 + $0x8] sm:$0x3f] (!%p225_p9)  ;;  %vm520_vm3 = vmpackc.low (!%p225_p9), %vm310_vm1, %vm578_vm2 }
  0x1f   : > { %516 = vmatprep.mubr.msk.f32.mxu0 (!%p225_p9), %vm303_vm0, %v289_v9  ;;  %v257_v10 = vld [vmem:[%s233_s7] sm:$0xff] (!%p225_p9)  ;;  %v290_v23 = vld [vmem:[%s698_s3 + $0x8] sm:$0x3f] (!%p225_p9) }
  0x21   : > { %282 = vperm.xlu1 (!%p225_p9), %552, %v274_v5   ;;  %268 = vperm.xlu0 (!%p225_p9), %551, %v260_v6  }
  0x23   : > { %s505_s10 = sshll.u32 (%p639_p5), %s492_s21, 3 }
  0x24   : > { %s399_s13 = scalar_lea.vmem (%p639_p5), %s700_s5, %s505_s10 }
  0x25   : > { %300 = vperm.xlu1 %552, %v292_v7   ;;  %295 = vperm.xlu0 %551, %v291_v8  }
  0x9c   : > { %v278_v11 = vpop.permute.xlu1 %277  ;;  %v264_v12 = vpop.permute.xlu0 %263 }
  0x9d   : > { %v271_v13 = vmul.f32 %v264_v12, %v257_v10 }
  0x9f   : > { %v285_v16 = vadd.f32 %v278_v11, %v271_v13 }
  0xa0   : > { %v269_v15 = vpop.permute.xlu0 %268  ;;  %v283_v18 = vpop.permute.xlu1 %282 }
  0xa1   : > { %v272_v17 = vmul.f32 %v269_v15, %v258_v14  ;;  %v287_v20 = vmax.f32 %v285_v16, 0.0 }
  0xa3   : > { %v286_v19 = vadd.f32 %v283_v18, %v272_v17 }
  0xa4   : > { %v301_v24 = vpop.permute.xlu1 %300  ;;  %v296_v26 = vpop.permute.xlu0 %295 }
  0xa5   : > { %v288_v21 = vmax.f32 %v286_v19, 0.0 }
  0xa7   : > { %v519_v22 = vpack.c.bf16 %v288_v21, %v287_v20 }
  0xa9   : > { %521 = vmatprep.subr.msk.bf16.mxu0 %vm520_vm3, %v519_v22 }
  0xaa   : > { %524 = vmatpush3.bf16.msk.msra.mxu0 %vm520_vm3, %v519_v22 }
  0xad   : > { %517 = vmatmul.mubr.msk.f32.vlgmr.msra.gmra.mrb[0].mxu0 %vm303_vm0, %v290_v23 }
 0x17e   : > { %397 = sbr.rel (!%p639_p5) target bundleno = 397 (0x18d), region = 82 }
 0x180   : > { %v518_v25 = vpop.f32.mrb[0].mxu0 }
 0x181   : > { %v386_v27 = vadd.f32 %v518_v25, %v301_v24  ;;  %v380_v28 = vpop.f32.mrb[1].mxu0 }
 0x182   : > { %v381_v29 = vadd.f32 %v380_v28, %v296_v26 }
 0x183   : > { %390 = vst [vmem:[%s256_s9 + $0x8] sm:$0x3f] %v386_v27 }
 0x184   : > { %389 = vst [vmem:[%s256_s9] sm:$0xff] %v381_v29 }
 0x18a   : > { %v431_v31 = vld [vmem:[%s256_s9 + $0x8] sm:$0xff] }
 0x18b   : > { %v429_v30 = vld [vmem:[%s256_s9] sm:$0xff]  ;;  %432 = vst [vmem:[%s399_s13 + $0x18] sm:$0xff] %v431_v31 }
 0x18c   : > { %430 = vst [vmem:[%s399_s13] sm:$0xff] %v429_v30 }
 0x18d PF: > { %p12_p10 = scmp.ge.s32.totalorder %s626_s22, 5   ;;  %s702_s18 = smov %s571_s19 }
 0x18e   : > { %s703_s19 = smov %s637_s25  ;;  %s704_s20 = smov %s626_s22 }
 0x18f   :  { %14 = sbr.rel (!%p12_p10) target bundleno = 2 (0x2), region = 151 }

// kernel: fcnet_forward.8
= control target key start
LH: loop header
LB: loop body
LE: loop exit
PB: predicated region body
PF: predicated region fallthrough
CT: control target
= control target key end

     0   :  { %s822_s0 = inlined_call_operand.<no memory space> [shape: s32[1], index: 0, kind: input, shape index: {}]   ;;  %s823_s1 = inlined_call_operand.vmem [shape: f32[14,384], index: 1, kind: input, shape index: {}]   ;;  %s824_s2 = inlined_call_operand.vmem [shape: f32[14,1], index: 2, kind: input, shape index: {}]   ;;  %s825_s3 = inlined_call_operand.vmem [shape: f32[14,1], index: 3, kind: input, shape index: {}]   ;;  %s826_s4 = inlined_call_operand.vmem [shape: f32[14,14], index: 4, kind: input, shape index: {}]   ;;  %s827_s5 = inlined_call_operand.vmem [shape: f32[14,384], index: 5, kind: output, shape index: {0}]   ;;  %s828_s6 = inlined_call_operand.vmem [shape: f32[14,1], index: 6, kind: output, shape index: {1}]   ;;  %s829_s7 = inlined_call_operand.vmem [shape: f32[14,1], index: 7, kind: output, shape index: {2}]  }
   0x1   :  { %13 = sst [smem:[#allocation3]] %s822_s0 }
   0x2   :  { %s697_s26 = smov 0   ;;  %s699_s27 = smov 0  }
   0x3   :  { %s701_s28 = smov 0  }
   0x4 LB: > { %s710_s0 = sadd.s32 4294967295, %s650_s28   ;;  %s712_s29 = sadd.s32 1, %s650_s28   ;;  %s650_s28 = sphi %s701_s28, %s833_s28   ;;  %s646_s27 = sphi %s699_s27, %s832_s27   ;;  %s642_s26 = sphi %s697_s26, %s831_s26  }
   0x5   : > { %s23_s30 = ssub.s32 %s650_s28, %s712_s29  ;;  %s26_s8 = sadd.s32 1, %s646_s27 }
   0x6   : > { %p24_p0 = scmp.eq.s32.totalorder %s23_s30, 0  ;;  %p33_p1 = scmp.ne.s32.totalorder %s646_s27, %s642_s26 }
   0x7   : > { %p34_p2 = scmp.eq.s32.totalorder %s650_s28, 0  ;;  %p126_p3 = scmp.eq.s32.totalorder %s710_s0, 2 }
   0x8   : > { %s720_s9 = scalar_select %p24_p0, %s646_s27, %s26_s8  }
   0x9   : > { %p35_p4 = por %p34_p2, %p33_p1  ;;  %p722_p5 = por %p126_p3, %p33_p1 }
   0xa   : > { %p567_p6 = scmp.ge.s32.totalorder %s650_s28, 3 }
   0xc   : > { %199 = sbr.rel (%p567_p6) target bundleno = 26 (0x1a), region = 28 }
  0x13   : > { %202 = sbr.rel (!%p35_p4) target bundleno = 26 (0x1a), region = 32  ;;  %s204_s11 = sand.u32 (%p35_p4), 1, %s646_s27  }
  0x14   : > { %s569_s12 = sshll.u32 (%p35_p4), %s650_s28, 3  ;;  %s568_s13 = sshll.u32 (%p35_p4), %s204_s11, 4 }
  0x15   : > { %s208_s16 = scalar_lea.vmem (%p35_p4), %s823_s1, %s569_s12  ;;  %s206_s17 = scalar_lea.vmem (%p35_p4), [#allocation4], %s568_s13 }
  0x16   : > { %v238_v0 = vld [vmem:[%s208_s16] sm:$0xff] (%p35_p4)  ;;  %v240_v1 = vld [vmem:[%s208_s16 + $0x18] sm:$0xff] (%p35_p4) }
  0x17   : > { %239 = vst [vmem:[%s206_s17] sm:$0xff] (%p35_p4), %v238_v0  ;;  %241 = vst [vmem:[%s206_s17 + $0x8] sm:$0xff] (%p35_p4), %v240_v1 }
  0x1a PF: > { %p570_p7 = scmp.ge.s32.totalorder %s650_s28, 1  ;;  %p246_p8 = scmp.lt.s32.totalorder %s650_s28, 4 }
  0x1c   : > { %p247_p9 = pnand %p570_p7, %p246_p8 }
  0x1d   : > { %s253_s18 = sand.u32 (!%p247_p9), 1, %s642_s26   ;;  %p573_p10 = scmp.ne.s32.totalorder (!%p247_p9), %s710_s0, 0 }
  0x1e   : > { %250 = sbr.rel (%p247_p9) target bundleno = 556 (0x22c), region = 70  ;;  %s731_s19 = sshll.u32 (!%p247_p9), %s253_s18, 4 }
  0x1f   : > { %s255_s20 = scalar_lea.vmem (!%p247_p9), [#allocation4], %s731_s19  ;;  %s735_s21 = scalar_lea.vmem (!%p247_p9), [#allocation5], %s731_s19 }
  0x25   : > { %284 = sbr.rel (%p573_p10) target bundleno = 44 (0x2c), region = 78  ;;  %vm285_vm0 = vcmask (!%p573_p10), 7168   ;;  %vm287_vm1 = vcmask (!%p573_p10), 5120   ;;  %v652_v2 = vmov (!%p573_p10), 0.0  }
  0x26   : > { %286 = vst.msk [vmem:[%s828_s6] sm:$0xff] (!%p573_p10), %vm285_vm0, %v652_v2  ;;  %289 = vst.msk [vmem:[%s829_s7] sm:$0xff] (!%p573_p10), %vm285_vm0, %v652_v2 }
  0x27   : > { %288 = vst.msk [vmem:[%s828_s6 + $0x8] sm:$0x3f] (!%p573_p10), %vm287_vm1, %v652_v2  ;;  %290 = vst.msk [vmem:[%s829_s7 + $0x8] sm:$0x3f] (!%p573_p10), %vm287_vm1, %v652_v2 }
  0x2c PF: > { %v308_v3 = vld [vmem:[%s825_s3 + $0x8] sm:$0x3f]  ;;  %v653_v5 = vmov 0   ;;  %v307_v6 = vld [vmem:[%s825_s3] sm:$0xff]  ;;  %vm337_vm2 = vcmask 113664   ;;  %v323_v9 = vlaneseq  ;;  %s328_s24 = sld [smem:[#allocation3]] }
  0x2d   : > { %v294_v4 = vld [vmem:[%s824_s2 + $0x8] sm:$0x3f]  ;;  %627 = vset.pattern.permute.xlu1 %v653_v5  ;;  %626 = vset.pattern.permute.xlu0 %v653_v5  ;;  %v293_v7 = vld [vmem:[%s824_s2] sm:$0xff]  ;;  %s574_s25 = sshll.u32 %s710_s0, 7  ;;  %vm344_vm4 = vcmask 1045504   ;;  %vm436_vm6 = vcmask 5120  }
  0x2e   : > { %316 = vperm.xlu1 %627, %v308_v3   ;;  %302 = vperm.xlu0 %626, %v294_v4   ;;  %v335_v8 = vld [vmem:[%s826_s4] sm:$0xff]  ;;  %v292_v10 = vld [vmem:[%s255_s20 + $0x8] sm:$0x3f]  ;;  %v324_v11 = vand.u32 127, %v323_v9  ;;  %v326_v14 = vstv %s574_s25  ;;  %vm434_vm7 = vcmask 7168   ;;  %s580_s19 = sshll.u32 (%p722_p5), %s710_s0, 3 }
  0x2f   : > { %591 = vmatprep.mubr.msk.f32.mxu0 %vm337_vm2, %v335_v8  ;;  %v291_v16 = vld [vmem:[%s255_s20] sm:$0xff]  ;;  %v336_v28 = vld [vmem:[%s826_s4 + $0x8] sm:$0x3f]  ;;  %s459_s28 = scalar_lea.vmem (%p722_p5), %s827_s5, %s580_s19 }
  0x30   : > { %v327_v18 = vadd.s32 %v326_v14, %v324_v11  ;;  %v426_v35 = vld [vmem:[%s828_s6 + $0x8] sm:$0x3f]  ;;  %v425_v36 = vld [vmem:[%s828_s6] sm:$0xff] }
  0x31   : > { %v438_v41 = vld [vmem:[%s829_s7] sm:$0xff]  ;;  %v439_v44 = vld [vmem:[%s829_s7 + $0x8] sm:$0x3f] }
  0x32   : > { %311 = vperm.xlu1 %627, %v307_v6   ;;  %297 = vperm.xlu0 %626, %v293_v7   ;;  %v329_v20 = vstv %s328_s24 }
  0x33   : > { %vm330_vm3 = vcmp.lt.s32.totalorder %v327_v18, %v329_v20 }
  0x34   : > { %vm595_vm5 = vmpackc.low %vm344_vm4, %vm330_vm3 }
  0xad   : > { %v317_v12 = vpop.permute.xlu1 %316  ;;  %v303_v13 = vpop.permute.xlu0 %302 }
  0xae   : > { %v306_v15 = vmul.f32 %v303_v13, %v292_v10 }
  0xb0   : > { %v320_v17 = vadd.f32 %v317_v12, %v306_v15 }
  0xb1   : > { %v298_v19 = vpop.permute.xlu0 %297  ;;  %v312_v23 = vpop.permute.xlu1 %311 }
  0xb2   : > { %v305_v21 = vmul.f32 %v298_v19, %v291_v16  ;;  %v322_v22 = vmax.f32 %v320_v17, 0.0 }
  0xb4   : > { %v319_v24 = vadd.f32 %v312_v23, %v305_v21  ;;  %v334_v26 = vsel %vm330_vm3, %v322_v22, 0.0 }
  0xb6   : > { %v321_v25 = vmax.f32 %v319_v24, 0.0 }
  0xb8   : > { %v594_v27 = vpack.c.bf16 %v334_v26, %v321_v25 }
  0xba   : > { %596 = vmatprep.subr.msk.bf16.mxu0 %vm595_vm5, %v594_v27 }
  0xbb   : > { %599 = vmatpush3.bf16.msk.msra.mxu0 %vm595_vm5, %v594_v27 }
  0xbe   : > { %592 = vmatmul.mubr.msk.f32.vlgmr.msra.gmra.mrb[0].mxu0 %vm337_vm2, %v336_v28 }
 0x191   : > { %v593_v29 = vpop.f32.mrb[0].mxu0 }
 0x192   : > { %424 = vst [vmem:[%s735_s21 + $0x8] sm:$0x3f] %v593_v29  ;;  %v414_v30 = vpop.f32.mrb[1].mxu0  ;;  %v429_v31 = vsel %vm344_vm4, %v593_v29, 0.0  ;;  %v441_v33 = vmul.f32 %v593_v29, %v593_v29 }
 0x193   : > { %423 = vst [vmem:[%s735_s21] sm:$0xff] %v414_v30  ;;  %430 = vadd.xlane.f32.xlu1 %v429_v31  ;;  %427 = vadd.xlane.f32.xlu0 %v414_v30  ;;  %v440_v32 = vmul.f32 %v414_v30, %v414_v30 }
 0x194   : > { %v444_v34 = vsel %vm344_vm4, %v441_v33, 0.0 }
 0x197   : > { %442 = vadd.xlane.f32.xlu0 %v440_v32 }
 0x199   : > { %v491_v48 = vld [vmem:[%s735_s21 + $0x8] sm:$0xff] (%p722_p5) }
 0x19a   : > { %v489_v47 = vld [vmem:[%s735_s21] sm:$0xff] (%p722_p5)  ;;  %492 = vst [vmem:[%s459_s28 + $0x18] sm:$0xff] (%p722_p5), %v491_v48 }
 0x19b   : > { %445 = vadd.xlane.f32.xlu0 %v444_v34  ;;  %490 = vst [vmem:[%s459_s28] sm:$0xff] (%p722_p5), %v489_v47 }
 0x220   : > { %v431_v37 = vpop.xlane.xlu1 %430  ;;  %v428_v38 = vpop.xlane.xlu0 %427 }
 0x221   : > { %v433_v39 = vadd.f32 %v431_v37, %v426_v35  ;;  %v432_v40 = vadd.f32 %v428_v38, %v425_v36 }
 0x223   : > { %437 = vst.msk [vmem:[%s828_s6 + $0x8] sm:$0x3f] %vm436_vm6, %v433_v39 }
 0x224   : > { %435 = vst.msk [vmem:[%s828_s6] sm:$0xff] %vm434_vm7, %v432_v40  ;;  %v443_v42 = vpop.xlane.xlu0 %442 }
 0x225   : > { %v447_v43 = vadd.f32 %v443_v42, %v438_v41  ;;  %457 = sbr.rel (!%p722_p5) target bundleno = 556 (0x22c), region = 82 }
 0x227   : > { %449 = vst.msk [vmem:[%s829_s7] sm:$0xff] %vm434_vm7, %v447_v43 }
 0x228   : > { %v446_v45 = vpop.xlane.xlu0 %445 }
 0x229   : > { %v448_v46 = vadd.f32 %v446_v45, %v439_v44 }
 0x22b   : > { %450 = vst.msk [vmem:[%s829_s7 + $0x8] sm:$0x3f] %vm436_vm6, %v448_v46 }
 0x22c PF: > { %p16_p11 = scmp.ge.s32.totalorder %s712_s29, 5   ;;  %s831_s26 = smov %s646_s27 }
 0x22d   : > { %s832_s27 = smov %s720_s9  ;;  %s833_s28 = smov %s712_s29 }
 0x22e   :  { %18 = sbr.rel (!%p16_p11) target bundleno = 4 (0x4), region = 167 }

</bundles_post_ra>
